<compile_context>
chip_gen: v5e
topology: v5e:2x2
jax: 0.10.0
libtpu: 0.0.40
codegen_flags: <defaults>
</compile_context>

<pallas_src>
import functools

import jax
import jax.numpy as jnp
from jax.experimental import pallas as pl
from jax.experimental.pallas import tpu as pltpu

_LANE = 128


def _round_up(a, b):
    return (a + b - 1) // b * b


def _make_kernel(n_valid, tile_n):
    """Kernel factory; n_valid / tile_n are static Python ints."""

    def kernel(x_ref, w1_ref, b1_ref, w2_ref, o_ref):
        # x: (tile_n, D)   w1: (H, D)   b1: (H, 1)   w2: (H, 1)
        # o: (num_tiles, tile_n) -- VMEM-resident across the whole grid.
        i = pl.program_id(0)

        # Linear(D -> H) on the MXU as an NT contraction: batch axis on lanes,
        # no host-side transpose of x.
        h = jnp.einsum(
            "hd,nd->hn", w1_ref[...], x_ref[...],
            preferred_element_type=jnp.float32,
        )                                                     # (H, tile_n) f32
        h = jnp.maximum(h + b1_ref[...], 0.0)                 # bias + ReLU (VPU)

        # Linear(H -> 1) as VPU multiply + XLU sublane reduce (not a 1-lane
        # MXU matmul).  b2 is omitted: it cancels in the dim-0 softmax.
        logits = jnp.sum(h * w2_ref[...], axis=0, keepdims=True)   # (1, tile_n)

        # Mask padded rows so they vanish from the softmax (max and exp-sum).
        lane = jax.lax.broadcasted_iota(jnp.int32, (1, tile_n), 1) + i * tile_n
        logits = jnp.where(lane < n_valid, logits, jnp.float32(-1e30))

        # Stage raw logits for this tile into the resident output block.
        o_ref[pl.ds(i, 1), :] = logits

        # Softmax epilogue on the last step over the whole resident block:
        # max/sum on XLU, exp on EUP, scale on VPU.  Single HBM writeback.
        @pl.when(i == pl.num_programs(0) - 1)
        def _():
            rows = o_ref[...]                                 # (num_tiles, tile_n)
            m = jnp.max(rows)
            e = jnp.exp(rows - m)                             # padded lanes -> 0
            s = jnp.sum(e)
            o_ref[...] = e * (1.0 / s)

    return kernel


def generator_forward(x, w1, b1, w2, b2=None, *,
                      compute_dtype=jnp.bfloat16, tile_n=None):
    """x: (N, D); w1: (H, D); b1: (H,); w2: (1, H); b2 ignored (softmax-invariant)."""
    del b2  # cancels in Softmax(dim=0); not worth a DMA.
    n, d = x.shape
    h_dim = w1.shape[0]

    # Lane-multiple N tile.  Review guidance: >=512 lanes for the large-N,
    # memory-bound regime; capped at 1024 (per-step x tile is tiny anyway).
    if tile_n is None:
        tile_n = min(1024, _round_up(n, _LANE))
    assert tile_n % _LANE == 0, "tile_n must be a multiple of 128 lanes"
    n_pad = _round_up(n, tile_n)
    num_tiles = n_pad // tile_n

    # bf16 for the streamed operand (and the matching weight); everything
    # downstream of the MXU stays f32.
    x_in = x.astype(compute_dtype)
    w1_in = w1.astype(compute_dtype)
    if n_pad != n:
        # Only the ragged tail is padded (no full extra copy for aligned N).
        x_in = jnp.pad(x_in, ((0, n_pad - n), (0, 0)))
    b1_col = b1.reshape(h_dim, 1).astype(jnp.float32)
    w2_col = w2.reshape(h_dim, 1).astype(jnp.float32)

    out_tiles = pl.pallas_call(
        _make_kernel(n, tile_n),
        out_shape=jax.ShapeDtypeStruct((num_tiles, tile_n), jnp.float32),
        grid=(num_tiles,),
        in_specs=[
            pl.BlockSpec((tile_n, d), lambda i: (i, 0)),   # stream x tiles
            pl.BlockSpec((h_dim, d), lambda i: (0, 0)),    # weights: VMEM-resident
            pl.BlockSpec((h_dim, 1), lambda i: (0, 0)),
            pl.BlockSpec((h_dim, 1), lambda i: (0, 0)),
        ],
        # Constant index_map -> logits stay VMEM-resident across the grid and
        # are written back to HBM once, after the softmax epilogue.
        out_specs=pl.BlockSpec((num_tiles, tile_n), lambda i: (0, 0)),
        compiler_params=pltpu.CompilerParams(
            dimension_semantics=("arbitrary",),  # softmax reduction axis
        ),
    )(x_in, w1_in, b1_col, w2_col)

    # Layout plumbing back to the module's (N, 1) output.
    return out_tiles.reshape(n_pad)[:n].reshape(n, 1)


def init_params(key, hrt_concat_dim, hidden=10):
    # PyTorch Linear default init, stored in PyTorch-native (out, in) layout:
    # U(-1/sqrt(fan_in), 1/sqrt(fan_in)).
    k1, k2, k3, k4 = jax.random.split(key, 4)
    bound1 = 1.0 / jnp.sqrt(jnp.float32(hrt_concat_dim))
    bound2 = 1.0 / jnp.sqrt(jnp.float32(hidden))
    w1 = jax.random.uniform(k1, (hidden, hrt_concat_dim), jnp.float32, -bound1, bound1)
    b1 = jax.random.uniform(k2, (hidden,), jnp.float32, -bound1, bound1)
    w2 = jax.random.uniform(k3, (1, hidden), jnp.float32, -bound2, bound2)
    b2 = jax.random.uniform(k4, (1,), jnp.float32, -bound2, bound2)
    return w1, b1, w2, b2


def reference_forward(x, w1, b1, w2, b2):
    # Exact PyTorch semantics (b2 included, full f32) for the correctness check.
    h = jnp.maximum(x @ w1.T + b1, 0.0)
    logits = h @ w2.T + b2
    return jax.nn.softmax(logits, axis=0)


if __name__ == "__main__":
    key = jax.random.PRNGKey(0)
    kx, kp = jax.random.split(key)

    N = 8                 # batch of (h, r, t) concatenated embeddings
    hrt_concat_dim = 32   # the module's single hyperparameter

    x = jax.random.normal(kx, (N, hrt_concat_dim), jnp.float32)
    w1, b1, w2, b2 = init_params(kp, hrt_concat_dim)

    fwd = jax.jit(generator_forward, static_argnames=("compute_dtype", "tile_n"))
    ref = reference_forward(x, w1, b1, w2, b2)

    # 1) Bit-accurate f32 path vs PyTorch-exact reference.
    out_f32 = fwd(x, w1, b1, w2, b2, compute_dtype=jnp.float32)
    jax.block_until_ready(out_f32)
    assert out_f32.shape == (N, 1)
    assert jnp.allclose(out_f32, ref, atol=1e-5, rtol=1e-5)
    assert jnp.allclose(jnp.sum(out_f32), 1.0, atol=1e-5)

    # 2) Default bf16 streaming path (the recommended memory-bound config).
    out_bf16 = fwd(x, w1, b1, w2, b2)
    jax.block_until_ready(out_bf16)
    assert out_bf16.shape == (N, 1)
    assert jnp.allclose(out_bf16, ref, atol=2e-2, rtol=2e-2)
    assert jnp.allclose(jnp.sum(out_bf16), 1.0, atol=1e-3)

    # 3) Multi-tile grid with a ragged (padded + masked) tail: N=300, tile=128.
    x2 = jax.random.normal(jax.random.PRNGKey(1), (300, hrt_concat_dim), jnp.float32)
    out2 = fwd(x2, w1, b1, w2, b2, compute_dtype=jnp.float32, tile_n=128)
    jax.block_until_ready(out2)
    ref2 = reference_forward(x2, w1, b1, w2, b2)
    assert out2.shape == (300, 1)
    assert jnp.allclose(out2, ref2, atol=1e-5, rtol=1e-5)
    assert jnp.allclose(jnp.sum(out2), 1.0, atol=1e-5)

    print("KERNEL_OK")
</pallas_src>

<mosaic_0001>
module attributes {stable_mosaic.version = 11 : i64} {
  func.func @kernel(%arg0: i32, %arg1: memref<128x32xf32, #tpu.memory_space<vmem>>, %arg2: memref<10x32xf32, #tpu.memory_space<vmem>>, %arg3: memref<10x1xf32, #tpu.memory_space<vmem>>, %arg4: memref<10x1xf32, #tpu.memory_space<vmem>>, %arg5: memref<1x128xf32, #tpu.memory_space<vmem>>) attributes {dimension_semantics = [#tpu.dimension_semantics<arbitrary>], iteration_bounds = array<i64: 1>, scalar_prefetch = 0 : i64, scratch_operands = 0 : i64, tpu.core_type = #tpu.core_type<tc>, window_params = [{transform_indices = @transform_0, window_bounds = array<i64: 128, 32>}, {pipeline_mode = #tpu.pipeline_mode<synchronous>, transform_indices = @transform_1, window_bounds = array<i64: 10, 32>}, {pipeline_mode = #tpu.pipeline_mode<synchronous>, transform_indices = @transform_2, window_bounds = array<i64: 10, 1>}, {pipeline_mode = #tpu.pipeline_mode<synchronous>, transform_indices = @transform_3, window_bounds = array<i64: 10, 1>}, {pipeline_mode = #tpu.pipeline_mode<synchronous>, transform_indices = @transform_4, window_bounds = array<i64: 1, 128>}]} {
    %c0 = arith.constant 0 : index
    %c0_0 = arith.constant 0 : index
    %0 = vector.load %arg2[%c0, %c0_0] : memref<10x32xf32, #tpu.memory_space<vmem>>, vector<10x32xf32>
    %c0_1 = arith.constant 0 : index
    %c0_2 = arith.constant 0 : index
    %1 = vector.load %arg1[%c0_1, %c0_2] : memref<128x32xf32, #tpu.memory_space<vmem>>, vector<128x32xf32>
    "tpu.trace_start"() <{level = 10 : i32, message = "hd,nd->hn"}> : () -> ()
    %cst = arith.constant dense<0.000000e+00> : vector<10x128xf32>
    %2 = tpu.matmul %0, %1, %cst {dimension_numbers = #tpu.dot_dimension_numbers<[1], [1], [0], [0], [0, 0, 1, 0], [], []>} : vector<10x32xf32>, vector<128x32xf32>, vector<10x128xf32> -> vector<10x128xf32>
    "tpu.trace_stop"() : () -> ()
    %c0_3 = arith.constant 0 : index
    %c0_4 = arith.constant 0 : index
    %3 = vector.load %arg3[%c0_3, %c0_4] : memref<10x1xf32, #tpu.memory_space<vmem>>, vector<10x1xf32>
    %4 = vector.broadcast %3 : vector<10x1xf32> to vector<10x128xf32>
    %5 = arith.addf %2, %4 : vector<10x128xf32>
    %cst_5 = arith.constant 0.000000e+00 : f32
    %6 = vector.broadcast %cst_5 : f32 to vector<10x128xf32>
    %7 = arith.maximumf %5, %6 : vector<10x128xf32>
    %c0_6 = arith.constant 0 : index
    %c0_7 = arith.constant 0 : index
    %8 = vector.load %arg4[%c0_6, %c0_7] : memref<10x1xf32, #tpu.memory_space<vmem>>, vector<10x1xf32>
    %9 = vector.broadcast %8 : vector<10x1xf32> to vector<10x128xf32>
    %10 = arith.mulf %7, %9 : vector<10x128xf32>
    %cst_8 = arith.constant dense<0.000000e+00> : vector<128xf32>
    %11 = vector.multi_reduction <add>, %10, %cst_8 [0] : vector<10x128xf32> to vector<128xf32>
    %12 = vector.shape_cast %11 : vector<128xf32> to vector<1x128xf32>
    %13 = tpu.iota {dimensions = array<i32: 1>} : vector<1x128xi32>
    %c128_i32 = arith.constant 128 : i32
    %14 = arith.muli %arg0, %c128_i32 : i32
    %15 = vector.broadcast %14 : i32 to vector<1x128xi32>
    %16 = arith.addi %13, %15 : vector<1x128xi32>
    %c8_i32 = arith.constant 8 : i32
    %17 = vector.broadcast %c8_i32 : i32 to vector<1x128xi32>
    %18 = arith.cmpi slt, %16, %17 : vector<1x128xi32>
    %cst_9 = arith.constant -1.000000e+30 : f32
    %19 = vector.broadcast %cst_9 : f32 to vector<1x128xf32>
    %20 = arith.select %18, %12, %19 : vector<1x128xi1>, vector<1x128xf32>
    %21 = arith.index_cast %arg0 : i32 to index
    %c0_10 = arith.constant 0 : index
    %22 = vector.load %arg5[%21, %c0_10] : memref<1x128xf32, #tpu.memory_space<vmem>>, vector<1x128xf32>
    tpu.vector_store %arg5[%21, %c0_10], %20 {strides = array<i32>} : memref<1x128xf32, #tpu.memory_space<vmem>>, vector<1x128xf32>,
    %c0_i32 = arith.constant 0 : i32
    %23 = arith.cmpi eq, %arg0, %c0_i32 : i32
    %24 = arith.extui %23 : i1 to i32
    %c0_i32_11 = arith.constant 0 : i32
    %25 = arith.cmpi ne, %24, %c0_i32_11 : i32
    scf.if %25 {
      %c0_12 = arith.constant 0 : index
      %c0_13 = arith.constant 0 : index
      %26 = vector.load %arg5[%c0_12, %c0_13] : memref<1x128xf32, #tpu.memory_space<vmem>>, vector<1x128xf32>
      %27 = vector.shape_cast %26 : vector<1x128xf32> to vector<1x1x128xf32>
      %cst_14 = arith.constant dense<0xFF800000> : vector<1xf32>
      %28 = vector.multi_reduction <maximumf>, %27, %cst_14 [1, 2] : vector<1x1x128xf32> to vector<1xf32>
      %29 = vector.shape_cast %28 : vector<1xf32> to vector<1x1x1xf32>
      %30 = vector.extract %29[0, 0, 0] : f32 from vector<1x1x1xf32>
      %31 = vector.broadcast %30 : f32 to vector<1x128xf32>
      %32 = arith.subf %26, %31 : vector<1x128xf32>
      %33 = math.exp %32 : vector<1x128xf32>
      %34 = vector.shape_cast %33 : vector<1x128xf32> to vector<1x1x128xf32>
      %cst_15 = arith.constant dense<0.000000e+00> : vector<1xf32>
      %35 = vector.multi_reduction <add>, %34, %cst_15 [1, 2] : vector<1x1x128xf32> to vector<1xf32>
      %36 = vector.shape_cast %35 : vector<1xf32> to vector<1x1x1xf32>
      %37 = vector.extract %36[0, 0, 0] : f32 from vector<1x1x1xf32>
      %cst_16 = arith.constant 1.000000e+00 : f32
      %38 = arith.divf %cst_16, %37 : f32
      %39 = vector.broadcast %38 : f32 to vector<1x128xf32>
      %40 = arith.mulf %33, %39 : vector<1x128xf32>
      %c0_17 = arith.constant 0 : index
      %c0_18 = arith.constant 0 : index
      %41 = vector.load %arg5[%c0_17, %c0_18] : memref<1x128xf32, #tpu.memory_space<vmem>>, vector<1x128xf32>
      tpu.vector_store %arg5[%c0_17, %c0_18], %40 {strides = array<i32>} : memref<1x128xf32, #tpu.memory_space<vmem>>, vector<1x128xf32>,
    } else {
    }
    return
  }
  func.func @transform_0(%arg0: i32) -> (i32, i32) {
    %c0_i32 = arith.constant 0 : i32
    %c0_i32_0 = arith.constant 0 : i32
    return %arg0, %c0_i32 : i32, i32
  }
  func.func @transform_1(%arg0: i32) -> (i32, i32) {
    %c0_i32 = arith.constant 0 : i32
    %c0_i32_0 = arith.constant 0 : i32
    %c0_i32_1 = arith.constant 0 : i32
    return %c0_i32, %c0_i32_0 : i32, i32
  }
  func.func @transform_2(%arg0: i32) -> (i32, i32) {
    %c0_i32 = arith.constant 0 : i32
    %c0_i32_0 = arith.constant 0 : i32
    %c0_i32_1 = arith.constant 0 : i32
    return %c0_i32, %c0_i32_0 : i32, i32
  }
  func.func @transform_3(%arg0: i32) -> (i32, i32) {
    %c0_i32 = arith.constant 0 : i32
    %c0_i32_0 = arith.constant 0 : i32
    %c0_i32_1 = arith.constant 0 : i32
    return %c0_i32, %c0_i32_0 : i32, i32
  }
  func.func @transform_4(%arg0: i32) -> (i32, i32) {
    %c0_i32 = arith.constant 0 : i32
    %c0_i32_0 = arith.constant 0 : i32
    %c0_i32_1 = arith.constant 0 : i32
    return %c0_i32, %c0_i32_0 : i32, i32
  }
}

</mosaic_0001>

<bundles_post_ra>
// kernel: generator_forward.1
= control target key start
LH: loop header
LB: loop body
LE: loop exit
PB: predicated region body
PF: predicated region fallthrough
CT: control target
= control target key end

     0   :  { %vm47_vm0 = vcmask 261120   ;;  %v258_v9 = vmov 0   ;;  %vm141_vm1 = vcmask 1041408   ;;  %v150_v38 = vlaneseq  ;;  %s395_s0 = inlined_call_operand.vmem [shape: f32[128,32], index: 0, kind: input, shape index: {}]   ;;  %s396_s2 = inlined_call_operand.vmem [shape: f32[10,1], index: 2, kind: input, shape index: {}]   ;;  %s397_s3 = inlined_call_operand.vmem [shape: f32[10,1], index: 3, kind: input, shape index: {}]   ;;  %s398_s1 = inlined_call_operand.vmem [shape: f32[10,32], index: 1, kind: input, shape index: {}]   ;;  %s399_s4 = inlined_call_operand.vmem [shape: f32[1,128], index: 4, kind: output, shape index: {}]  }
   0x1   :  { %v34_v0 = vld [vmem:[%s395_s0 + $0x78] sm:$0xff]  ;;  %v33_v1 = vld [vmem:[%s395_s0 + $0x70] sm:$0xff]  ;;  %v32_v2 = vld [vmem:[%s395_s0 + $0x68] sm:$0xff]  ;;  %252 = vset.pattern.permute.xlu0 %v258_v9  ;;  %253 = vset.pattern.permute.xlu1 %v258_v9  ;;  %vm163_vm3 = vcmask 1040384  }
   0x2   :  { %211 = vmatpush.xpose.msk.msra.mxu0 %vm47_vm0, %v34_v0  ;;  %229 = vmatpush.xpose.msk.msra.mxu1 %vm47_vm0, %v34_v0  ;;  %v31_v3 = vld [vmem:[%s395_s0 + $0x60] sm:$0xff]  ;;  %v30_v4 = vld [vmem:[%s395_s0 + $0x58] sm:$0xff]  ;;  %v29_v5 = vld [vmem:[%s395_s0 + $0x50] sm:$0xff]  ;;  %v151_v41 = vand.u32 127, %v150_v38 }
   0x3   :  { %v28_v6 = vld [vmem:[%s395_s0 + $0x48] sm:$0xff]  ;;  %v27_v8 = vld [vmem:[%s395_s0 + $0x40] sm:$0xff]  ;;  %v26_v11 = vld [vmem:[%s395_s0 + $0x38] sm:$0xff] }
   0x4   :  { %v36_v7 = vld [vmem:[%s396_s2 + $0x8] sm:$0x3]  ;;  %v35_v12 = vld [vmem:[%s396_s2] sm:$0xff]  ;;  %v25_v13 = vld [vmem:[%s395_s0 + $0x30] sm:$0xff]  ;;  %vm155_vm2 = vcmp.lt.s32.totalorder %v151_v41, 8 }
   0x5   :  { %44 = vperm.xlu0 %252, %v36_v7   ;;  %v128_v10 = vld [vmem:[%s397_s3 + $0x8] sm:$0x3]  ;;  %v127_v14 = vld [vmem:[%s397_s3] sm:$0xff]  ;;  %v22_v17 = vld [vmem:[%s395_s0 + $0x18] sm:$0xff] }
   0x6   :  { %212 = vmatpush.xpose.msk.msra.mxu0 %vm47_vm0, %v33_v1  ;;  %230 = vmatpush.xpose.msk.msra.mxu1 %vm47_vm0, %v33_v1  ;;  %v24_v15 = vld [vmem:[%s395_s0 + $0x28] sm:$0xff]  ;;  %v23_v16 = vld [vmem:[%s395_s0 + $0x20] sm:$0xff]  ;;  %v21_v18 = vld [vmem:[%s395_s0 + $0x10] sm:$0xff] }
   0x7   :  { %136 = vperm.xlu1 %253, %v128_v10   ;;  %v20_v19 = vld [vmem:[%s395_s0 + $0x8] sm:$0xff]  ;;  %v19_v20 = vld [vmem:[%s395_s0] sm:$0xff] }
   0x8   :  { %v17_v21 = vld [vmem:[%s398_s1] sm:$0xff]  ;;  %v18_v22 = vld [vmem:[%s398_s1 + $0x8] sm:$0x3] }
   0xa   :  { %213 = vmatpush.xpose.msk.msra.mxu0 %vm47_vm0, %v32_v2  ;;  %231 = vmatpush.xpose.msk.msra.mxu1 %vm47_vm0, %v32_v2 }
   0xd   :  { %39 = vperm.xlu0 %252, %v35_v12  }
   0xe   :  { %214 = vmatpush.xpose.msk.msra.mxu0 %vm47_vm0, %v31_v3  ;;  %232 = vmatpush.xpose.msk.msra.mxu1 %vm47_vm0, %v31_v3 }
   0xf   :  { %131 = vperm.xlu1 %253, %v127_v14  }
  0x12   :  { %215 = vmatpush.xpose.msk.msra.mxu0 %vm47_vm0, %v30_v4  ;;  %233 = vmatpush.xpose.msk.msra.mxu1 %vm47_vm0, %v30_v4 }
  0x16   :  { %216 = vmatpush.xpose.msk.msra.mxu0 %vm47_vm0, %v29_v5  ;;  %234 = vmatpush.xpose.msk.msra.mxu1 %vm47_vm0, %v29_v5 }
  0x1a   :  { %217 = vmatpush.xpose.msk.msra.mxu0 %vm47_vm0, %v28_v6  ;;  %235 = vmatpush.xpose.msk.msra.mxu1 %vm47_vm0, %v28_v6 }
  0x1e   :  { %218 = vmatpush.xpose.msk.msra.mxu0 %vm47_vm0, %v27_v8  ;;  %236 = vmatpush.xpose.msk.msra.mxu1 %vm47_vm0, %v27_v8 }
  0x22   :  { %219 = vmatpush.xpose.msk.msra.mxu0 %vm47_vm0, %v26_v11  ;;  %237 = vmatpush.xpose.msk.msra.mxu1 %vm47_vm0, %v26_v11 }
  0x26   :  { %220 = vmatpush.xpose.msk.msra.mxu0 %vm47_vm0, %v25_v13  ;;  %238 = vmatpush.xpose.msk.msra.mxu1 %vm47_vm0, %v25_v13 }
  0x2a   :  { %221 = vmatpush.xpose.msk.msra.mxu0 %vm47_vm0, %v24_v15  ;;  %239 = vmatpush.xpose.msk.msra.mxu1 %vm47_vm0, %v24_v15 }
  0x2e   :  { %222 = vmatpush.xpose.msk.msra.mxu0 %vm47_vm0, %v23_v16  ;;  %240 = vmatpush.xpose.msk.msra.mxu1 %vm47_vm0, %v23_v16 }
  0x32   :  { %223 = vmatpush.xpose.msk.msra.mxu0 %vm47_vm0, %v22_v17  ;;  %241 = vmatpush.xpose.msk.msra.mxu1 %vm47_vm0, %v22_v17 }
  0x36   :  { %224 = vmatpush.xpose.msk.msra.mxu0 %vm47_vm0, %v21_v18  ;;  %242 = vmatpush.xpose.msk.msra.mxu1 %vm47_vm0, %v21_v18 }
  0x3a   :  { %225 = vmatpush.xpose.msk.msra.mxu0 %vm47_vm0, %v20_v19  ;;  %243 = vmatpush.xpose.msk.msra.mxu1 %vm47_vm0, %v20_v19 }
  0x3e   :  { %226 = vmatpush.xpose.msk.msra.mxu0 %vm47_vm0, %v19_v20  ;;  %244 = vmatpush.xpose.msk.msra.mxu1 %vm47_vm0, %v19_v20 }
  0x41   :  { %227 = vmatmul.msk.f32.vlgmr.msra.gmra.mxu0 %vm47_vm0, %v17_v21  ;;  %228 = vmatmul.msk.f32.vlgmr.msra.gmra.mxu1 %vm47_vm0, %v18_v22 }
  0x77   :  { %v45_v23 = vpop.permute.xlu0 %44 }
  0x79   :  { %v137_v24 = vpop.permute.xlu1 %136 }
  0x7f   :  { %v40_v25 = vpop.permute.xlu0 %39 }
  0x81   :  { %v132_v32 = vpop.permute.xlu1 %131 }
  0xbe   :  { %v119_v26 = vpop.f32.mrf.mxu0  ;;  %v122_v27 = vpop.f32.mrf.mxu1 }
  0xbf   :  { %v120_v28 = vadd.f32 %v119_v26, %v40_v25  ;;  %v123_v29 = vadd.f32 %v122_v27, %v45_v23 }
  0xc1   :  { %v125_v30 = vmax.f32 %v120_v28, 0.0  ;;  %v126_v31 = vmax.f32 %v123_v29, 0.0 }
  0xc3   :  { %v139_v33 = vmul.f32 %v132_v32, %v125_v30  ;;  %v140_v34 = vmul.f32 %v137_v24, %v126_v31 }
  0xc5   :  { %v142_v35 = vsel %vm141_vm1, %v140_v34, 0.0 }
  0xc6   :  { %v143_v36 = vadd.f32 %v142_v35, %v139_v33 }
  0xc8   :  { %v144_v37 = vrot.slane %v143_v36, 4 }
  0xca   :  { %v145_v39 = vadd.f32 %v144_v37, %v143_v36 }
  0xcc   :  { %v146_v40 = vrot.slane %v145_v39, 2 }
  0xce   :  { %v147_v42 = vadd.f32 %v146_v40, %v145_v39 }
  0xd0   :  { %v148_v43 = vrot.slane %v147_v42, 1 }
  0xd2   :  { %v149_v44 = vadd.f32 %v148_v43, %v147_v42 }
  0xd4   :  { %v156_v45 = vsel %vm155_vm2, %v149_v44, -1e+30 }
  0xd5   :  { %157 = vst [vmem:[%s399_s4] sm:$0x1] %v156_v45 }
  0xdc   :  { %v162_v46 = vld [vmem:[%s399_s4] sm:$0x1] }
  0xdd   :  { %v164_v47 = vsel %vm163_vm3, %v162_v46, -inf }
  0xde   :  { %165 = vmax.xlane.f32.xlu2 %v164_v47 }
 0x151   :  { %v166_v48 = vpop.xlane.xlu2 %165 }
 0x152   :  { %v167_v49 = vrot.slane %v166_v48, 4 }
 0x154   :  { %v168_v50 = vmax.f32 %v166_v48, %v167_v49 }
 0x156   :  { %v169_v51 = vrot.slane %v168_v50, 2 }
 0x158   :  { %v170_v52 = vmax.f32 %v168_v50, %v169_v51 }
 0x15a   :  { %v171_v53 = vrot.slane %v170_v52, 1 }
 0x15c   :  { %v172_v54 = vmax.f32 %v170_v52, %v171_v53 }
 0x15e   :  { %245 = vpush %v172_v54 }
 0x18f   :  { %s246_s7 = spop %245 }
 0x190   :  { %v174_v55 = vstv %s246_s7 }
 0x191   :  { %v175_v56 = vsub.f32 %v162_v46, %v174_v55 }
 0x193   :  { %v176_v57 = vmul.f32 1.442695, %v175_v56 }
 0x195   :  { %254 = vpow2.f32 %v176_v57 }
 0x19b   :  { %v255_v58 = vpop.eup %254 }
 0x19c   :  { %v178_v59 = vsel %vm163_vm3, %v255_v58, 0.0 }
 0x19d   :  { %179 = vadd.xlane.f32.xlu2 %v178_v59 }
 0x210   :  { %v180_v60 = vpop.xlane.xlu2 %179 }
 0x211   :  { %v181_v61 = vrot.slane %v180_v60, 4 }
 0x213   :  { %v182_v62 = vadd.f32 %v181_v61, %v180_v60 }
 0x215   :  { %v183_v63 = vrot.slane %v182_v62, 2 }
 0x217   :  { %v184_v0 = vadd.f32 %v183_v63, %v182_v62 }
 0x219   :  { %v185_v1 = vrot.slane %v184_v0, 1 }
 0x21b   :  { %v186_v2 = vadd.f32 %v185_v1, %v184_v0 }
 0x21d   :  { %247 = vpush %v186_v2 }
 0x24e   :  { %s248_s8 = spop %247 }
 0x24f   :  { %v188_v3 = vstv %s248_s8 }
 0x250   :  { %256 = vrcp.f32 %v188_v3  ;;  %v200_v7 = vand.u32 2147483648, %v188_v3  ;;  %v198_v9 = vand.u32 2147483647, %v188_v3  ;;  %vm194_vm5 = vweird.f32 %v188_v3 }
 0x252   :  { %v201_v11 = vor.u32 1.1754944e-38, %v200_v7  ;;  %vm199_vm7 = vcmp.eq.f32.partialorder %v198_v9, 8.507059e+37 }
 0x256   :  { %v257_v4 = vpop.eup %256 }
 0x257   :  { %v190_v5 = vmul.f32 %v257_v4, %v188_v3  ;;  %vm195_vm4 = vweird.f32 %v257_v4 }
 0x258   :  { %vm196_vm6 = vmor %vm194_vm5, %vm195_vm4 }
 0x259   :  { %v191_v6 = vsub.f32 1.0, %v190_v5 }
 0x25b   :  { %v192_v8 = vmul.f32 %v257_v4, %v191_v6 }
 0x25d   :  { %v193_v10 = vadd.f32 %v257_v4, %v192_v8 }
 0x25f   :  { %v197_v12 = vsel %vm196_vm6, %v257_v4, %v193_v10 }
 0x260   :  { %v202_v13 = vsel %vm199_vm7, %v201_v11, %v197_v12 }
 0x261   :  { %249 = vpush %v202_v13 }
 0x292   :  { %s250_s9 = spop %249 }
 0x293   :  { %v204_v14 = vstv %s250_s9 }
 0x294   :  { %v205_v15 = vmul.f32 %v255_v58, %v204_v14 }
 0x296   :  { %206 = vst [vmem:[%s399_s4] sm:$0x1] %v205_v15 }

</bundles_post_ra>
